<compile_context>
chip_gen: v5e
topology: v5e:2x2
jax: 0.10.0
libtpu: 0.0.40
codegen_flags: <defaults>
</compile_context>

<pallas_src>
import numpy as np
import jax
import jax.numpy as jnp
from jax import lax
from jax.experimental import pallas as pl
from jax.experimental.pallas import tpu as pltpu

N_CHANNELS = 1
N_CLASSES = 7
HIDDEN = 32
K = 3
STRIDE = 2
RF = STRIDE * STRIDE + K          # conv2 receptive field in x: 4 + 3 = 7
N_PAD = 128                       # lane-dense output / packing width
T2_CHUNK = 16                     # conv2 output positions per inner chunk

# Row offsets inside the packed weight slab (all multiples of 8).
W1_R0 = 0                         # rows [0, 8)    : banded conv1 (7 rows used)
W2_R0 = 8                         # rows [8, 104)  : fused conv2 im2col (96)
W3_R0 = 104                       # rows [104, 136): linear1 (32)
W4_R0 = 136                       # rows [136, 168): linear2 (32, padded lanes)
W_ROWS = 168


def _simple_conv_kernel(x_ref, w_ref, b_ref, o_ref):
    # x_ref: (b_blk, L)       bf16, batch in sublanes, time in lanes (lane-dense)
    # w_ref: (W_ROWS, N_PAD)  bf16 packed weights (see row offsets above)
    # b_ref: (8, N_PAD)       f32 packed biases (rows 0..3)
    # o_ref: (b_blk, N_PAD)   f32, logits in lanes [:N_CLASSES]
    b_blk, L = x_ref.shape
    L1 = (L - K) // STRIDE + 1
    L2 = (L1 - K) // STRIDE + 1
    G = min(T2_CHUNK, L2)                         # positions per inner chunk
    n_chunks = -(-L2 // G)
    win_w = (STRIDE * STRIDE) * (G - 1) + RF      # x samples feeding one chunk

    # Packed weights / biases, loaded once (hoisted out of the chunk loop).
    w1 = w_ref[W1_R0:W1_R0 + RF, 0:K * HIDDEN]            # (7, 96)  banded conv1
    w2 = w_ref[W2_R0:W2_R0 + K * HIDDEN, 0:HIDDEN]        # (96, 32) fused conv2
    w3 = w_ref[W3_R0:W3_R0 + HIDDEN, 0:HIDDEN]            # (32, 32)
    w4 = w_ref[W4_R0:W4_R0 + HIDDEN, :]                   # (32, 128), cols >=7 zero
    b1 = b_ref[0:1, 0:K * HIDDEN]                          # f32
    b2 = b_ref[1:2, 0:HIDDEN]
    b3 = b_ref[2:3, 0:HIDDEN]
    b4 = b_ref[3:4, :]

    def chunk_body(c, pooled):
        # First conv2 position of this chunk.  The last chunk is shifted left
        # so it stays in-bounds; recomputed positions are harmless under a max.
        if isinstance(c, int):                             # static path
            start = min(c * G, L2 - G) * (STRIDE * STRIDE)
        else:                                              # dynamic path
            start = jnp.minimum(c * G, L2 - G) * (STRIDE * STRIDE)
        xs = x_ref[:, pl.ds(start, win_w)]                 # (b_blk, 4G+3) bf16

        # In-register im2col for the chunk: window j covers xs[:, 4j : 4j+7].
        # Rows are time-major (window-major) so the pool below is elementwise.
        im = jnp.concatenate(
            [xs[:, (STRIDE * STRIDE) * j:(STRIDE * STRIDE) * j + RF]
             for j in range(G)],
            axis=0)                                        # (G*b_blk, 7) bf16

        # conv1 (all 3 conv2 taps at once via banded weights) + ReLU
        h1 = jnp.dot(im, w1, preferred_element_type=jnp.float32) + b1
        h1 = jnp.maximum(h1, 0.0).astype(jnp.bfloat16)     # (G*b_blk, 96)
        # conv2 (fused im2col matmul) + ReLU
        h2 = jnp.dot(h1, w2, preferred_element_type=jnp.float32) + b2
        h2 = jnp.maximum(h2, 0.0)                          # (G*b_blk, 32) f32

        # Time-major max-pool: G elementwise maxima of (b_blk, 32) slabs (VPU).
        cmax = jnp.max(h2.reshape(G, b_blk, HIDDEN), axis=0)
        return jnp.maximum(pooled, cmax)

    # ReLU guarantees h2 >= 0, so zero-init equals the true max over time.
    pooled0 = jnp.zeros((b_blk, HIDDEN), jnp.float32)
    if n_chunks == 1:
        pooled = chunk_body(0, pooled0)                    # fully static slices
    else:
        pooled = lax.fori_loop(0, n_chunks, chunk_body, pooled0)

    # linear1 + ReLU, linear2 (lane-dense 128-wide store, logits in lanes [:7])
    h3 = jnp.dot(pooled.astype(jnp.bfloat16), w3,
                 preferred_element_type=jnp.float32) + b3
    h3 = jnp.maximum(h3, 0.0)
    out = jnp.dot(h3.astype(jnp.bfloat16), w4,
                  preferred_element_type=jnp.float32) + b4
    o_ref[...] = out.astype(o_ref.dtype)


def _tpu_config():
    """(vmem_limit_bytes, n_tensorcores) heuristic for the local TPU gen."""
    try:
        kind = jax.devices()[0].device_kind.lower()
    except Exception:
        kind = ""
    is_v7 = "7" in kind                        # e.g. "tpu7x"; v5e/v6e have no '7'
    phys_vmem = (64 if is_v7 else 128) * (1 << 20)
    vmem_limit = min(phys_vmem // 2, 64 * (1 << 20))   # leave generous headroom
    n_tc = 2 if is_v7 else 1
    return vmem_limit, n_tc


def _pick_b_blk(batch, L, G, vmem_limit, n_tc):
    """Batch rows per grid step derived from a VMEM byte budget."""
    lp = -(-L // 128) * 128                    # lane-padded input width
    # per-sample VMEM (bytes): double-buffered bf16 input block + per-chunk
    # temporaries (im bf16, h1 f32 + bf16 copy, h2 f32; all lane-padded to 128).
    per_sample = 2 * 2 * lp + G * (256 + 512 + 256 + 512) + 2048
    budget = vmem_limit // 3                   # headroom: weights, out bufs, scratch
    b = max(8, (budget // per_sample) // 8 * 8)
    if batch > 8 * n_tc:                       # keep >= n_tc grid steps (v7x megacore)
        per_core = ((-(-batch // n_tc)) + 7) // 8 * 8
        b = min(b, per_core)
    b = min(b, (batch + 7) // 8 * 8)           # never bigger than the padded batch
    b = min(b, 1024)                           # keep per-step latency reasonable
    return int(max(8, b))


def simple_conv_forward(x_ncw, params):
    """x_ncw: (B, 1, L) float32, NCW like PyTorch.  Returns (B, n_classes)."""
    w1, b1, w2, b2, w3, b3, w4, b4 = params
    B, C, L = x_ncw.shape
    assert C == N_CHANNELS == 1
    L1 = (L - K) // STRIDE + 1
    L2 = (L1 - K) // STRIDE + 1
    assert L1 >= K and L2 >= 1, "input too short for the two stride-2 convs"
    G = min(T2_CHUNK, L2)

    vmem_limit, n_tc = _tpu_config()
    b_blk = _pick_b_blk(B, L, G, vmem_limit, n_tc)
    b_pad = -(-B // b_blk) * b_blk

    # --- input: no gather, no im2col.  One fused batch-pad + bf16 cast. ------
    x_f = x_ncw[:, 0, :]
    if b_pad == B:
        x_in = x_f.astype(jnp.bfloat16)
    else:
        x_in = jnp.zeros((b_pad, L), jnp.bfloat16).at[:B, :].set(
            x_f.astype(jnp.bfloat16))

    # --- pack the 8 weight/bias tensors into 2 operands (done per call here;
    #     in real use pre-pack once) -------------------------------------------
    # conv1 -> banded (RF, 3*HIDDEN): one matmul computes all 3 conv2 taps
    w1m = w1[:, 0, :].astype(jnp.float32)                       # (32, 3)
    w1big = jnp.zeros((RF, K * HIDDEN), jnp.float32)
    for k in range(K):
        w1big = w1big.at[k * STRIDE:k * STRIDE + K,
                         k * HIDDEN:(k + 1) * HIDDEN].set(w1m.T)
    # conv2 -> fused im2col matrix (3*HIDDEN, HIDDEN)
    w2f = jnp.transpose(w2.astype(jnp.float32), (2, 1, 0)).reshape(
        K * HIDDEN, HIDDEN)
    w3t = jnp.transpose(w3).astype(jnp.float32)
    w4p = jnp.zeros((HIDDEN, N_PAD), jnp.float32).at[:, :N_CLASSES].set(
        jnp.transpose(w4).astype(jnp.float32))

    wpk = jnp.zeros((W_ROWS, N_PAD), jnp.float32)
    wpk = wpk.at[W1_R0:W1_R0 + RF, :K * HIDDEN].set(w1big)
    wpk = wpk.at[W2_R0:W2_R0 + K * HIDDEN, :HIDDEN].set(w2f)
    wpk = wpk.at[W3_R0:W3_R0 + HIDDEN, :HIDDEN].set(w3t)
    wpk = wpk.at[W4_R0:W4_R0 + HIDDEN, :].set(w4p)
    wpk = wpk.astype(jnp.bfloat16)                              # bf16 matmul operands

    bpk = jnp.zeros((8, N_PAD), jnp.float32)                    # biases stay f32
    bpk = bpk.at[0, :K * HIDDEN].set(jnp.tile(b1.astype(jnp.float32), K))
    bpk = bpk.at[1, :HIDDEN].set(b2.astype(jnp.float32))
    bpk = bpk.at[2, :HIDDEN].set(b3.astype(jnp.float32))
    bpk = bpk.at[3, :N_CLASSES].set(b4.astype(jnp.float32))

    out = pl.pallas_call(
        _simple_conv_kernel,
        out_shape=jax.ShapeDtypeStruct((b_pad, N_PAD), jnp.float32),
        grid=(b_pad // b_blk,),
        in_specs=[
            pl.BlockSpec((b_blk, L), lambda i: (i, 0)),         # raw signal
            pl.BlockSpec((W_ROWS, N_PAD), lambda i: (0, 0)),    # packed weights
            pl.BlockSpec((8, N_PAD), lambda i: (0, 0)),         # packed biases
        ],
        out_specs=pl.BlockSpec((b_blk, N_PAD), lambda i: (i, 0)),
        compiler_params=pltpu.CompilerParams(
            dimension_semantics=("parallel",),
            vmem_limit_bytes=vmem_limit),
    )(x_in, wpk, bpk)
    return out[:B, :N_CLASSES]


def init_params(key):
    """Deterministic synthetic init (PyTorch-like uniform fan-in bounds)."""
    ks = jax.random.split(key, 8)

    def u(k, shape, fan_in):
        bound = 1.0 / np.sqrt(fan_in)
        return jax.random.uniform(k, shape, jnp.float32, -bound, bound)

    w1 = u(ks[0], (HIDDEN, N_CHANNELS, K), N_CHANNELS * K)   # Conv1d(1, 32, 3)
    b1 = u(ks[1], (HIDDEN,), N_CHANNELS * K)
    w2 = u(ks[2], (HIDDEN, HIDDEN, K), HIDDEN * K)           # Conv1d(32, 32, 3)
    b2 = u(ks[3], (HIDDEN,), HIDDEN * K)
    w3 = u(ks[4], (HIDDEN, HIDDEN), HIDDEN)                  # Linear(32, 32)
    b3 = u(ks[5], (HIDDEN,), HIDDEN)
    w4 = u(ks[6], (N_CLASSES, HIDDEN), HIDDEN)               # Linear(32, 7)
    b4 = u(ks[7], (N_CLASSES,), HIDDEN)
    return (w1, b1, w2, b2, w3, b3, w4, b4)


def reference_forward(x_ncw, params):
    """Plain-JAX f32 reference matching the PyTorch forward (independent path)."""
    w1, b1, w2, b2, w3, b3, w4, b4 = params

    def conv1d(x, w, b):                      # x: (B, Cin, L), w: (Cout, Cin, K)
        L = x.shape[-1]
        Lo = (L - K) // STRIDE + 1
        cols = jnp.stack(
            [x[:, :, k:k + STRIDE * (Lo - 1) + 1:STRIDE] for k in range(K)],
            axis=-1)                          # (B, Cin, Lo, K)
        return jnp.einsum('bilk,oik->bol', cols, w) + b[None, :, None]

    y = jax.nn.relu(conv1d(x_ncw, w1, b1))
    y = jax.nn.relu(conv1d(y, w2, b2))
    y = jnp.max(y, axis=-1)                   # AdaptiveMaxPool1d(1) + view(-1, 32)
    y = jax.nn.relu(y @ w3.T + b3)
    return y @ w4.T + b4


if __name__ == "__main__":
    key = jax.random.PRNGKey(0)
    kx, kp = jax.random.split(key)
    B, L = 2, 64
    x = jax.random.normal(kx, (B, N_CHANNELS, L), jnp.float32)
    params = init_params(kp)

    fwd = jax.jit(simple_conv_forward)
    out = jax.block_until_ready(fwd(x, params))
    ref = jax.block_until_ready(reference_forward(x, params))

    assert out.shape == (B, N_CLASSES)
    # bf16 matmul operands (f32 accumulation) -> slightly looser tolerance.
    np.testing.assert_allclose(np.asarray(out), np.asarray(ref),
                               rtol=2e-2, atol=2e-2)
    print("KERNEL_OK")
</pallas_src>

<mosaic_0001>
module attributes {stable_mosaic.version = 11 : i64} {
  func.func @_simple_conv_kernel(%arg0: i32, %arg1: memref<8x64xbf16, #tpu.memory_space<vmem>>, %arg2: memref<168x128xbf16, #tpu.memory_space<vmem>>, %arg3: memref<8x128xf32, #tpu.memory_space<vmem>>, %arg4: memref<8x128xf32, #tpu.memory_space<vmem>>) attributes {dimension_semantics = [#tpu.dimension_semantics<parallel>], iteration_bounds = array<i64: 1>, scalar_prefetch = 0 : i64, scratch_operands = 0 : i64, tpu.core_type = #tpu.core_type<tc>, window_params = [{transform_indices = @transform_0, window_bounds = array<i64: 8, 64>}, {pipeline_mode = #tpu.pipeline_mode<synchronous>, transform_indices = @transform_1, window_bounds = array<i64: 168, 128>}, {pipeline_mode = #tpu.pipeline_mode<synchronous>, transform_indices = @transform_2, window_bounds = array<i64: 8, 128>}, {transform_indices = @transform_3, window_bounds = array<i64: 8, 128>}]} {
    %c0 = arith.constant 0 : index
    %c0_0 = arith.constant 0 : index
    %0 = vector.load %arg2[%c0, %c0_0] : memref<168x128xbf16, #tpu.memory_space<vmem>>, vector<7x96xbf16>
    %c8 = arith.constant 8 : index
    %c0_1 = arith.constant 0 : index
    %1 = vector.load %arg2[%c8, %c0_1] : memref<168x128xbf16, #tpu.memory_space<vmem>>, vector<96x32xbf16>
    %c104 = arith.constant 104 : index
    %c0_2 = arith.constant 0 : index
    %2 = vector.load %arg2[%c104, %c0_2] : memref<168x128xbf16, #tpu.memory_space<vmem>>, vector<32x32xbf16>
    %c136 = arith.constant 136 : index
    %c0_3 = arith.constant 0 : index
    %3 = vector.load %arg2[%c136, %c0_3] : memref<168x128xbf16, #tpu.memory_space<vmem>>, vector<32x128xbf16>
    %c0_4 = arith.constant 0 : index
    %c0_5 = arith.constant 0 : index
    %4 = vector.load %arg3[%c0_4, %c0_5] : memref<8x128xf32, #tpu.memory_space<vmem>>, vector<1x96xf32>
    %c1 = arith.constant 1 : index
    %c0_6 = arith.constant 0 : index
    %5 = vector.load %arg3[%c1, %c0_6] : memref<8x128xf32, #tpu.memory_space<vmem>>, vector<1x32xf32>
    %c2 = arith.constant 2 : index
    %c0_7 = arith.constant 0 : index
    %6 = vector.load %arg3[%c2, %c0_7] : memref<8x128xf32, #tpu.memory_space<vmem>>, vector<1x32xf32>
    %c3 = arith.constant 3 : index
    %c0_8 = arith.constant 0 : index
    %7 = vector.load %arg3[%c3, %c0_8] : memref<8x128xf32, #tpu.memory_space<vmem>>, vector<1x128xf32>
    %cst = arith.constant 0.000000e+00 : f32
    %8 = vector.broadcast %cst : f32 to vector<8x32xf32>
    %c0_9 = arith.constant 0 : index
    %c0_10 = arith.constant 0 : index
    %9 = vector.load %arg1[%c0_9, %c0_10] : memref<8x64xbf16, #tpu.memory_space<vmem>>, vector<8x63xbf16>
    %10 = vector.extract_strided_slice %9 {offsets = [0, 0], sizes = [8, 7], strides = [1, 1]} : vector<8x63xbf16> to vector<8x7xbf16>
    %11 = vector.extract_strided_slice %9 {offsets = [0, 4], sizes = [8, 7], strides = [1, 1]} : vector<8x63xbf16> to vector<8x7xbf16>
    %12 = vector.extract_strided_slice %9 {offsets = [0, 8], sizes = [8, 7], strides = [1, 1]} : vector<8x63xbf16> to vector<8x7xbf16>
    %13 = vector.extract_strided_slice %9 {offsets = [0, 12], sizes = [8, 7], strides = [1, 1]} : vector<8x63xbf16> to vector<8x7xbf16>
    %14 = vector.extract_strided_slice %9 {offsets = [0, 16], sizes = [8, 7], strides = [1, 1]} : vector<8x63xbf16> to vector<8x7xbf16>
    %15 = vector.extract_strided_slice %9 {offsets = [0, 20], sizes = [8, 7], strides = [1, 1]} : vector<8x63xbf16> to vector<8x7xbf16>
    %16 = vector.extract_strided_slice %9 {offsets = [0, 24], sizes = [8, 7], strides = [1, 1]} : vector<8x63xbf16> to vector<8x7xbf16>
    %17 = vector.extract_strided_slice %9 {offsets = [0, 28], sizes = [8, 7], strides = [1, 1]} : vector<8x63xbf16> to vector<8x7xbf16>
    %18 = vector.extract_strided_slice %9 {offsets = [0, 32], sizes = [8, 7], strides = [1, 1]} : vector<8x63xbf16> to vector<8x7xbf16>
    %19 = vector.extract_strided_slice %9 {offsets = [0, 36], sizes = [8, 7], strides = [1, 1]} : vector<8x63xbf16> to vector<8x7xbf16>
    %20 = vector.extract_strided_slice %9 {offsets = [0, 40], sizes = [8, 7], strides = [1, 1]} : vector<8x63xbf16> to vector<8x7xbf16>
    %21 = vector.extract_strided_slice %9 {offsets = [0, 44], sizes = [8, 7], strides = [1, 1]} : vector<8x63xbf16> to vector<8x7xbf16>
    %22 = vector.extract_strided_slice %9 {offsets = [0, 48], sizes = [8, 7], strides = [1, 1]} : vector<8x63xbf16> to vector<8x7xbf16>
    %23 = vector.extract_strided_slice %9 {offsets = [0, 52], sizes = [8, 7], strides = [1, 1]} : vector<8x63xbf16> to vector<8x7xbf16>
    %24 = vector.extract_strided_slice %9 {offsets = [0, 56], sizes = [8, 7], strides = [1, 1]} : vector<8x63xbf16> to vector<8x7xbf16>
    %25 = tpu.concatenate %10, %11, %12, %13, %14, %15, %16, %17, %18, %19, %20, %21, %22, %23, %24 in 0 : vector<8x7xbf16>, vector<8x7xbf16>, vector<8x7xbf16>, vector<8x7xbf16>, vector<8x7xbf16>, vector<8x7xbf16>, vector<8x7xbf16>, vector<8x7xbf16>, vector<8x7xbf16>, vector<8x7xbf16>, vector<8x7xbf16>, vector<8x7xbf16>, vector<8x7xbf16>, vector<8x7xbf16>, vector<8x7xbf16> -> vector<120x7xbf16>
    %cst_11 = arith.constant dense<0.000000e+00> : vector<120x96xf32>
    %26 = tpu.matmul %25, %0, %cst_11 {dimension_numbers = #tpu.dot_dimension_numbers<[1], [0], [0], [1], [0, 0, 1, 1], [], []>} : vector<120x7xbf16>, vector<7x96xbf16>, vector<120x96xf32> -> vector<120x96xf32>
    %27 = vector.broadcast %4 : vector<1x96xf32> to vector<120x96xf32>
    %28 = arith.addf %26, %27 : vector<120x96xf32>
    %cst_12 = arith.constant 0.000000e+00 : f32
    %29 = vector.broadcast %cst_12 : f32 to vector<120x96xf32>
    %30 = arith.maximumf %28, %29 : vector<120x96xf32>
    %31 = arith.truncf %30 : vector<120x96xf32> to vector<120x96xbf16>
    %cst_13 = arith.constant dense<0.000000e+00> : vector<120x32xf32>
    %32 = tpu.matmul %31, %1, %cst_13 {dimension_numbers = #tpu.dot_dimension_numbers<[1], [0], [0], [1], [0, 0, 1, 1], [], []>} : vector<120x96xbf16>, vector<96x32xbf16>, vector<120x32xf32> -> vector<120x32xf32>
    %33 = vector.broadcast %5 : vector<1x32xf32> to vector<120x32xf32>
    %34 = arith.addf %32, %33 : vector<120x32xf32>
    %cst_14 = arith.constant 0.000000e+00 : f32
    %35 = vector.broadcast %cst_14 : f32 to vector<120x32xf32>
    %36 = arith.maximumf %34, %35 : vector<120x32xf32>
    %37 = vector.shape_cast %36 : vector<120x32xf32> to vector<15x8x32xf32>
    %cst_15 = arith.constant dense<0xFF800000> : vector<8x32xf32>
    %38 = vector.multi_reduction <maximumf>, %37, %cst_15 [0] : vector<15x8x32xf32> to vector<8x32xf32>
    %39 = arith.maximumf %8, %38 : vector<8x32xf32>
    %40 = arith.truncf %39 : vector<8x32xf32> to vector<8x32xbf16>
    %cst_16 = arith.constant dense<0.000000e+00> : vector<8x32xf32>
    %41 = tpu.matmul %40, %2, %cst_16 {dimension_numbers = #tpu.dot_dimension_numbers<[1], [0], [0], [1], [0, 0, 1, 1], [], []>} : vector<8x32xbf16>, vector<32x32xbf16>, vector<8x32xf32> -> vector<8x32xf32>
    %42 = vector.broadcast %6 : vector<1x32xf32> to vector<8x32xf32>
    %43 = arith.addf %41, %42 : vector<8x32xf32>
    %cst_17 = arith.constant 0.000000e+00 : f32
    %44 = vector.broadcast %cst_17 : f32 to vector<8x32xf32>
    %45 = arith.maximumf %43, %44 : vector<8x32xf32>
    %46 = arith.truncf %45 : vector<8x32xf32> to vector<8x32xbf16>
    %cst_18 = arith.constant dense<0.000000e+00> : vector<8x128xf32>
    %47 = tpu.matmul %46, %3, %cst_18 {dimension_numbers = #tpu.dot_dimension_numbers<[1], [0], [0], [1], [0, 0, 1, 1], [], []>} : vector<8x32xbf16>, vector<32x128xbf16>, vector<8x128xf32> -> vector<8x128xf32>
    %48 = vector.broadcast %7 : vector<1x128xf32> to vector<8x128xf32>
    %49 = arith.addf %47, %48 : vector<8x128xf32>
    %c0_19 = arith.constant 0 : index
    %c0_20 = arith.constant 0 : index
    %50 = vector.load %arg4[%c0_19, %c0_20] : memref<8x128xf32, #tpu.memory_space<vmem>>, vector<8x128xf32>
    tpu.vector_store %arg4[%c0_19, %c0_20], %49 {strides = array<i32>} : memref<8x128xf32, #tpu.memory_space<vmem>>, vector<8x128xf32>,
    return
  }
  func.func @transform_0(%arg0: i32) -> (i32, i32) {
    %c0_i32 = arith.constant 0 : i32
    %c0_i32_0 = arith.constant 0 : i32
    return %arg0, %c0_i32 : i32, i32
  }
  func.func @transform_1(%arg0: i32) -> (i32, i32) {
    %c0_i32 = arith.constant 0 : i32
    %c0_i32_0 = arith.constant 0 : i32
    %c0_i32_1 = arith.constant 0 : i32
    return %c0_i32, %c0_i32_0 : i32, i32
  }
  func.func @transform_2(%arg0: i32) -> (i32, i32) {
    %c0_i32 = arith.constant 0 : i32
    %c0_i32_0 = arith.constant 0 : i32
    %c0_i32_1 = arith.constant 0 : i32
    return %c0_i32, %c0_i32_0 : i32, i32
  }
  func.func @transform_3(%arg0: i32) -> (i32, i32) {
    %c0_i32 = arith.constant 0 : i32
    %c0_i32_0 = arith.constant 0 : i32
    return %arg0, %c0_i32 : i32, i32
  }
}

</mosaic_0001>

<bundles_post_ra>
// kernel: tile.8
= control target key start
LH: loop header
LB: loop body
LE: loop exit
PB: predicated region body
PF: predicated region fallthrough
CT: control target
= control target key end

     0   :  { %s22_s0 = inlined_call_operand.vmem [shape: f32[32], index: 0, kind: input, shape index: {}]   ;;  %s23_s1 = inlined_call_operand.vmem [shape: f32[3,32], index: 1, kind: output, shape index: {}]  }
   0x1   :  { %v4_v0 = vld [vmem:[%s22_s0] ss:$0 sm:$0xff] }
   0x2   :  { %5 = vst [vmem:[%s23_s1] sm:$0xf] %v4_v0 }

// kernel: simple_conv_forward.1
= control target key start
LH: loop header
LB: loop body
LE: loop exit
PB: predicated region body
PF: predicated region fallthrough
CT: control target
= control target key end

     0   :  { %s512_s14 = smov 124   ;;  %s513_s15 = smov 116   ;;  %vm72_vm0 = vcmask 1043456   ;;  %vm113_vm1 = vcmask 1042432   ;;  %v515_v4 = vmov 65535   ;;  %vm95_vm2 = vcmask 56320   ;;  %s639_s0 = inlined_call_operand.vmem [shape: bf16[8,64], index: 0, kind: input, shape index: {}]   ;;  %s640_s1 = inlined_call_operand.vmem [shape: bf16[168,128], index: 1, kind: input, shape index: {}]   ;;  %s641_s2 = inlined_call_operand.vmem [shape: f32[8,128], index: 2, kind: input, shape index: {}]   ;;  %s642_s3 = inlined_call_operand.vmem [shape: f32[8,128], index: 3, kind: output, shape index: {}]  }
   0x1   :  { %v40_v0 = vld [vmem:[%s639_s0] sm:$0xf]  ;;  %s514_s16 = smov 108   ;;  %v114_v5 = vsel %vm113_vm1, 4294967295, %v515_v4  ;;  %s516_s0 = smov 120   ;;  %v475_v27 = vld [vmem:[%s640_s1 + $0x2c] sm:$0xff] }
   0x2   :  { %v42_v1 = vunpack.c.l.b16 %v40_v0  ;;  %v15_v3 = vld [vmem:[%s640_s1] sm:$0xf]  ;;  %v115_v6 = vsel %vm72_vm0, %v114_v5, 0  ;;  %s517_s19 = smov 112   ;;  %s518_s20 = smov 104   ;;  %254 = vmatpush.bf16.msra.mxu1 %v475_v27  ;;  %v474_v28 = vld [vmem:[%s640_s1 + $0x24] sm:$0xff]  ;;  %481 = vmatpush.bf16.msra.mxu2 %v475_v27 }
   0x3   :  { %v117_v7 = vand.u32 %v115_v6, %v15_v3  ;;  %s519_s21 = smov 100   ;;  %s520_s22 = smov 96   ;;  %v473_v31 = vld [vmem:[%s640_s1 + $0x1c] sm:$0xff]  ;;  %v472_v32 = vld [vmem:[%s640_s1 + $0x14] sm:$0xff]  ;;  %v471_v33 = vld [vmem:[%s640_s1 + $0xc] sm:$0xff]  ;;  %vm227_vm3 = vcmask 785408  }
   0x4   :  { %v43_v2 = vpack.c.b16 %v42_v1, %v42_v1  ;;  %s521_s23 = smov 92   ;;  %s522_s24 = smov 88   ;;  %v470_v34 = vld [vmem:[%s640_s1 + $0x4] sm:$0xff]  ;;  %v508_v36 = vld [vmem:[%s641_s2] ss:$0 sm:$0xff]  ;;  %vm315_vm4 = vcmask 261120  }
   0x5   :  { %126 = vmatpush.bf16.msra.mxu0 %v117_v7  ;;  %480 = vmatpush.bf16.msra.mxu3 %v117_v7  ;;  %s523_s25 = smov 84   ;;  %s524_s26 = smov 80  }
   0x6   :  { %44 = vrot.lane.b32.xlu0 %v43_v2, %s512_s14  ;;  %48 = vrot.lane.b32.xlu1 %v43_v2, %s513_s15  ;;  %s525_s27 = smov 76   ;;  %s526_s28 = smov 72  }
   0x7   :  { %52 = vrot.lane.b32.xlu2 %v43_v2, %s514_s16  ;;  %255 = vmatpush.bf16.msra.mxu1 %v474_v28 }
   0x8   :  { %483 = vmatpush.bf16.msra.mxu2 %v474_v28 }
   0x9   :  { %482 = vmatpush.bf16.msrb.mxu3 %v475_v27 }
   0xb   :  { %256 = vmatpush.bf16.msra.mxu1 %v473_v31 }
   0xc   :  { %485 = vmatpush.bf16.msra.mxu2 %v473_v31 }
   0xd   :  { %484 = vmatpush.bf16.msrb.mxu3 %v474_v28 }
   0xe   :  { %46 = vrot.lane.b32.xlu0 %v43_v2, %s516_s0  ;;  %50 = vrot.lane.b32.xlu1 %v43_v2, %s517_s19 }
   0xf   :  { %54 = vrot.lane.b32.xlu2 %v43_v2, %s518_s20  ;;  %257 = vmatpush.bf16.msra.mxu1 %v472_v32 }
  0x10   :  { %487 = vmatpush.bf16.msra.mxu2 %v472_v32 }
  0x11   :  { %486 = vmatpush.bf16.msrb.mxu3 %v473_v31 }
  0x13   :  { %258 = vmatpush.bf16.msra.mxu1 %v471_v33 }
  0x14   :  { %489 = vmatpush.bf16.msra.mxu2 %v471_v33 }
  0x15   :  { %488 = vmatpush.bf16.msrb.mxu3 %v472_v32 }
  0x16   :  { %56 = vrot.lane.b32.xlu0 %v43_v2, %s519_s21  ;;  %58 = vrot.lane.b32.xlu1 %v43_v2, %s520_s22 }
  0x17   :  { %60 = vrot.lane.b32.xlu2 %v43_v2, %s521_s23  ;;  %259 = vmatpush.bf16.msra.mxu1 %v470_v34 }
  0x18   :  { %491 = vmatpush.bf16.msra.mxu2 %v470_v34 }
  0x19   :  { %490 = vmatpush.bf16.msrb.mxu3 %v471_v33 }
  0x1d   :  { %492 = vmatpush.bf16.msrb.mxu3 %v470_v34 }
  0x1e   :  { %62 = vrot.lane.b32.xlu0 %v43_v2, %s522_s24  ;;  %64 = vrot.lane.b32.xlu1 %v43_v2, %s523_s25 }
  0x1f   :  { %66 = vrot.lane.b32.xlu2 %v43_v2, %s524_s26 }
  0x26   :  { %68 = vrot.lane.b32.xlu0 %v43_v2, %s525_s27  ;;  %70 = vrot.lane.b32.xlu1 %v43_v2, %s526_s28 }
  0x61   :  { %v53_v11 = vpop.permute.xlu2 %52 }
  0x69   :  { %v55_v14 = vpop.permute.xlu2 %54 }
  0x71   :  { %v61_v17 = vpop.permute.xlu2 %60 }
  0x78   :  { %v45_v8 = vpop.permute.xlu0 %44  ;;  %v49_v12 = vpop.permute.xlu1 %48 }
  0x79   :  { %v75_v9 = vsel %vm72_vm0, %v40_v0, %v45_v8  ;;  %v67_v21 = vpop.permute.xlu2 %66 }
  0x7a   :  { %412 = vmatmul.msk.bf16.vlgmr.msra.gmra.mxu0 %vm95_vm2, %v75_v9 }
  0x80   :  { %v47_v10 = vpop.permute.xlu0 %46  ;;  %v51_v16 = vpop.permute.xlu1 %50 }
  0x81   :  { %v78_v13 = vsel %vm72_vm0, %v47_v10, %v49_v12  ;;  %v81_v19 = vsel %vm72_vm0, %v51_v16, %v53_v11 }
  0x88   :  { %v57_v15 = vpop.permute.xlu0 %56  ;;  %v59_v20 = vpop.permute.xlu1 %58 }
  0x89   :  { %v84_v25 = vsel %vm72_vm0, %v55_v14, %v57_v15  ;;  %v87_v29 = vsel %vm72_vm0, %v59_v20, %v61_v17 }
  0x8a   :  { %413 = vmatmul.msk.bf16.gmra.mxu0 %vm95_vm2, %v78_v13 }
  0x90   :  { %v63_v18 = vpop.permute.xlu0 %62  ;;  %v65_v24 = vpop.permute.xlu1 %64 }
  0x91   :  { %v90_v30 = vsel %vm72_vm0, %v63_v18, %v65_v24 }
  0x98   :  { %v69_v22 = vpop.permute.xlu0 %68  ;;  %v71_v26 = vpop.permute.xlu1 %70 }
  0x99   :  { %v93_v23 = vsel %vm72_vm0, %v67_v21, %v69_v22 }
  0x9a   :  { %414 = vmatmul.msk.bf16.gmra.mxu0 %vm95_vm2, %v81_v19  ;;  %418 = vmatmul.msk.bf16.vlgmr.msra.gmra.mxu3 %vm95_vm2, %v93_v23 }
  0xaa   :  { %415 = vmatmul.msk.bf16.gmra.mxu0 %vm95_vm2, %v84_v25  ;;  %419 = vmatmul.msk.bf16.gmra.mxu3 %vm95_vm2, %v71_v26 }
  0xba   :  { %416 = vmatmul.msk.bf16.gmra.mxu0 %vm95_vm2, %v87_v29  ;;  %v477_v29 = vld [vmem:[%s640_s1 + $0x3c] sm:$0xff] }
  0xbb   :  { %369 = vmatpush.bf16.msrb.mxu2 %v477_v29 }
  0xca   :  { %417 = vmatmul.msk.bf16.gmra.mxu0 %vm95_vm2, %v90_v30 }
  0xf7   :  { %v128_v35 = vpop.f32.mrf.mxu0 }
  0xf8   :  { %v129_v37 = vadd.f32 %v508_v36, %v128_v35  ;;  %v476_v35 = vld [vmem:[%s640_s1 + $0x34] sm:$0xff] }
  0xf9   :  { %370 = vmatpush.bf16.msrb.mxu2 %v476_v35 }
  0xfa   :  { %v167_v40 = vmax.f32 %v129_v37, 0.0 }
  0xff   :  { %v130_v38 = vpop.f32.mrf.mxu0 }
 0x100   :  { %v131_v39 = vadd.f32 %v508_v36, %v130_v38 }
 0x102   :  { %v168_v41 = vmax.f32 %v131_v39, 0.0 }
 0x104   :  { %v182_v42 = vpack.c.bf16 %v168_v41, %v167_v40  ;;  %v479_v41 = vld [vmem:[%s640_s1 + $0x4c] sm:$0xff] }
 0x105   :  { %400 = vmatpush.bf16.msra.mxu3 %v479_v41 }
 0x106   :  { %444 = vmatmul.msk.bf16.vlgmr.msra.gmra.mxu1 %vm227_vm3, %v182_v42  ;;  %v478_v42 = vld [vmem:[%s640_s1 + $0x44] sm:$0xff] }
 0x107   :  { %v133_v43 = vpop.f32.mrf.mxu0 }
 0x108   :  { %v134_v44 = vadd.f32 %v508_v36, %v133_v43  ;;  %v509_v43 = vld [vmem:[%s641_s2 + $0x1] ss:$0 sm:$0xff] }
 0x109   :  { %401 = vmatpush.bf16.msra.mxu3 %v478_v42 }
 0x10a   :  { %v169_v47 = vmax.f32 %v134_v44, 0.0 }
 0x10f   :  { %v135_v45 = vpop.f32.mrf.mxu0 }
 0x110   :  { %v136_v46 = vadd.f32 %v508_v36, %v135_v45 }
 0x112   :  { %v170_v48 = vmax.f32 %v136_v46, 0.0 }
 0x114   :  { %v183_v49 = vpack.c.bf16 %v170_v48, %v169_v47 }
 0x116   :  { %445 = vmatmul.msk.bf16.gmra.mxu1 %vm227_vm3, %v183_v49 }
 0x117   :  { %v138_v50 = vpop.f32.mrf.mxu0 }
 0x118   :  { %v139_v51 = vadd.f32 %v508_v36, %v138_v50 }
 0x11a   :  { %v171_v55 = vmax.f32 %v139_v51, 0.0 }
 0x11d   :  { %v158_v54 = vpop.f32.mrf.mxu3 }
 0x11e   :  { %v159_v21 = vadd.f32 %v508_v36, %v158_v54 }
 0x11f   :  { %v140_v52 = vpop.f32.mrf.mxu0 }
 0x120   :  { %v141_v53 = vadd.f32 %v508_v36, %v140_v52  ;;  %v179_v23 = vmax.f32 %v159_v21, 0.0 }
 0x122   :  { %v172_v56 = vmax.f32 %v141_v53, 0.0 }
 0x124   :  { %v184_v57 = vpack.c.bf16 %v172_v56, %v171_v55 }
 0x125   :  { %v160_v59 = vpop.f32.mrf.mxu3 }
 0x126   :  { %446 = vmatmul.msk.bf16.gmra.mxu1 %vm227_vm3, %v184_v57  ;;  %v161_v22 = vadd.f32 %v508_v36, %v160_v59 }
 0x127   :  { %v143_v58 = vpop.f32.mrf.mxu0 }
 0x128   :  { %v144_v60 = vadd.f32 %v508_v36, %v143_v58  ;;  %v180_v24 = vmax.f32 %v161_v22, 0.0 }
 0x12a   :  { %v173_v0 = vmax.f32 %v144_v60, 0.0  ;;  %v188_v25 = vpack.c.bf16 %v180_v24, %v179_v23 }
 0x12d   :  { %v163_v63 = vpop.f32.mrf.mxu3 }
 0x12e   :  { %v164_v2 = vadd.f32 %v508_v36, %v163_v63 }
 0x12f   :  { %v145_v61 = vpop.f32.mrf.mxu0 }
 0x130   :  { %v146_v62 = vadd.f32 %v508_v36, %v145_v61  ;;  %v181_v4 = vmax.f32 %v164_v2, 0.0 }
 0x132   :  { %v174_v1 = vmax.f32 %v146_v62, 0.0  ;;  %v189_v5 = vpack.c.bf16 %v181_v4, %v181_v4 }
 0x134   :  { %v185_v3 = vpack.c.bf16 %v174_v1, %v173_v0  ;;  %451 = vmatmul.msk.bf16.vlgmr.msrb.gmra.mxu3 %vm227_vm3, %v189_v5 }
 0x135   :  { %v165_v7 = vpop.f32.mrf.mxu3 }
 0x136   :  { %447 = vmatmul.msk.bf16.gmra.mxu1 %vm227_vm3, %v185_v3 }
 0x137   :  { %v148_v6 = vpop.f32.mrf.mxu0 }
 0x138   :  { %v149_v8 = vadd.f32 %v508_v36, %v148_v6 }
 0x13a   :  { %v175_v11 = vmax.f32 %v149_v8, 0.0 }
 0x13f   :  { %v150_v9 = vpop.f32.mrf.mxu0 }
 0x140   :  { %v151_v10 = vadd.f32 %v508_v36, %v150_v9 }
 0x142   :  { %v176_v12 = vmax.f32 %v151_v10, 0.0 }
 0x144   :  { %v186_v13 = vpack.c.bf16 %v176_v12, %v175_v11 }
 0x146   :  { %448 = vmatmul.msk.bf16.vlgmr.msra.gmra.mxu2 %vm227_vm3, %v186_v13 }
 0x147   :  { %v153_v14 = vpop.f32.mrf.mxu0 }
 0x148   :  { %v154_v15 = vadd.f32 %v508_v36, %v153_v14 }
 0x14a   :  { %v177_v18 = vmax.f32 %v154_v15, 0.0 }
 0x14f   :  { %v155_v16 = vpop.f32.mrf.mxu0 }
 0x150   :  { %v156_v17 = vadd.f32 %v508_v36, %v155_v16 }
 0x152   :  { %v178_v19 = vmax.f32 %v156_v17, 0.0 }
 0x154   :  { %v187_v20 = vpack.c.bf16 %v178_v19, %v177_v18 }
 0x156   :  { %449 = vmatmul.msk.bf16.gmra.mxu2 %vm227_vm3, %v187_v20 }
 0x166   :  { %450 = vmatmul.msk.bf16.gmra.mxu2 %vm227_vm3, %v188_v25 }
 0x183   :  { %v261_v26 = vpop.f32.mrf.mxu1 }
 0x184   :  { %v262_v51 = vadd.f32 %v509_v43, %v261_v26 }
 0x186   :  { %v300_v2 = vmax.f32 %v262_v51, 0.0 }
 0x188   :  { %v316_v16 = vsel %vm315_vm4, %v300_v2, -inf }
 0x18b   :  { %v263_v27 = vpop.f32.mrf.mxu1 }
 0x18c   :  { %v264_v52 = vadd.f32 %v509_v43, %v263_v27 }
 0x18e   :  { %v301_v3 = vmax.f32 %v264_v52, 0.0 }
 0x190   :  { %v317_v17 = vsel %vm315_vm4, %v301_v3, -inf }
 0x193   :  { %v266_v28 = vpop.f32.mrf.mxu1 }
 0x194   :  { %v267_v46 = vadd.f32 %v509_v43, %v266_v28 }
 0x196   :  { %v302_v59 = vmax.f32 %v267_v46, 0.0 }
 0x198   :  { %v318_v9 = vsel %vm315_vm4, %v302_v59, -inf }
 0x19b   :  { %v268_v31 = vpop.f32.mrf.mxu1 }
 0x19c   :  { %v269_v53 = vadd.f32 %v509_v43, %v268_v31 }
 0x19e   :  { %v303_v4 = vmax.f32 %v269_v53, 0.0 }
 0x1a0   :  { %v319_v18 = vsel %vm315_vm4, %v303_v4, -inf }
 0x1a3   :  { %v271_v33 = vpop.f32.mrf.mxu1 }
 0x1a4   :  { %v272_v47 = vadd.f32 %v509_v43, %v271_v33 }
 0x1a6   :  { %v304_v60 = vmax.f32 %v272_v47, 0.0 }
 0x1a8   :  { %v320_v10 = vsel %vm315_vm4, %v304_v60, -inf }
 0x1a9   :  { %v321_v25 = vmax.f32 %v316_v16, %v320_v10 }
 0x1ab   :  { %v273_v36 = vpop.f32.mrf.mxu1 }
 0x1ac   :  { %v274_v48 = vadd.f32 %v509_v43, %v273_v36 }
 0x1ae   :  { %v305_v61 = vmax.f32 %v274_v48, 0.0 }
 0x1b0   :  { %v322_v11 = vsel %vm315_vm4, %v305_v61, -inf }
 0x1b1   :  { %v323_v26 = vmax.f32 %v317_v17, %v322_v11 }
 0x1b3   :  { %v276_v39 = vpop.f32.mrf.mxu1 }
 0x1b4   :  { %v277_v45 = vadd.f32 %v509_v43, %v276_v39 }
 0x1b6   :  { %v306_v55 = vmax.f32 %v277_v45, 0.0 }
 0x1b7   :  { %v296_v30 = vpop.f32.mrf.mxu3 }
 0x1b8   :  { %v297_v0 = vadd.f32 %v509_v43, %v296_v30  ;;  %v324_v5 = vsel %vm315_vm4, %v306_v55, -inf }
 0x1b9   :  { %v325_v19 = vmax.f32 %v318_v9, %v324_v5 }
 0x1ba   :  { %v314_v14 = vmax.f32 %v297_v0, 0.0 }
 0x1bb   :  { %v278_v44 = vpop.f32.mrf.mxu1 }
 0x1bc   :  { %v279_v49 = vadd.f32 %v509_v43, %v278_v44  ;;  %v340_v29 = vsel %vm315_vm4, %v314_v14, -inf  ;;  %v510_v44 = vld [vmem:[%s641_s2 + $0x2] ss:$0 sm:$0xff] }
 0x1be   :  { %v307_v62 = vmax.f32 %v279_v49, 0.0 }
 0x1bf   :  { %v298_v32 = vpop.f32.mrf.mxu3 }
 0x1c0   :  { %v326_v12 = vsel %vm315_vm4, %v307_v62, -inf }
 0x1c1   :  { %v327_v27 = vmax.f32 %v319_v18, %v326_v12 }
 0x1c9   :  { %v281_v34 = vpop.f32.mrf.mxu2 }
 0x1ca   :  { %v282_v56 = vadd.f32 %v509_v43, %v281_v34 }
 0x1cc   :  { %v308_v6 = vmax.f32 %v282_v56, 0.0 }
 0x1ce   :  { %v328_v21 = vsel %vm315_vm4, %v308_v6, -inf }
 0x1cf   :  { %v329_v32 = vmax.f32 %v321_v25, %v328_v21 }
 0x1d1   :  { %v283_v37 = vpop.f32.mrf.mxu2 }
 0x1d2   :  { %v284_v57 = vadd.f32 %v509_v43, %v283_v37 }
 0x1d4   :  { %v309_v7 = vmax.f32 %v284_v57, 0.0 }
 0x1d6   :  { %v330_v22 = vsel %vm315_vm4, %v309_v7, -inf }
 0x1d7   :  { %v331_v33 = vmax.f32 %v323_v26, %v330_v22 }
 0x1d9   :  { %v286_v38 = vpop.f32.mrf.mxu2 }
 0x1da   :  { %v287_v50 = vadd.f32 %v509_v43, %v286_v38 }
 0x1dc   :  { %v310_v63 = vmax.f32 %v287_v50, 0.0  ;;  %v511_v50 = vld [vmem:[%s641_s2 + $0x3] ss:$0 sm:$0xff] }
 0x1de   :  { %v332_v13 = vsel %vm315_vm4, %v310_v63, -inf }
 0x1df   :  { %v333_v28 = vmax.f32 %v325_v19, %v332_v13 }
 0x1e1   :  { %v288_v40 = vpop.f32.mrf.mxu2  ;;  %v341_v36 = vmax.f32 %v333_v28, %v340_v29 }
 0x1e2   :  { %v289_v58 = vadd.f32 %v509_v43, %v288_v40 }
 0x1e4   :  { %v311_v8 = vmax.f32 %v289_v58, 0.0 }
 0x1e6   :  { %v334_v23 = vsel %vm315_vm4, %v311_v8, -inf }
 0x1e7   :  { %v335_v34 = vmax.f32 %v327_v27, %v334_v23 }
 0x1e9   :  { %v291_v54 = vpop.f32.mrf.mxu2  ;;  %v343_v39 = vmax.f32 %v341_v36, %v335_v34 }
 0x1ea   :  { %v292_v1 = vadd.f32 %v509_v43, %v291_v54 }
 0x1ec   :  { %v312_v15 = vmax.f32 %v292_v1, 0.0 }
 0x1ee   :  { %v336_v30 = vsel %vm315_vm4, %v312_v15, -inf }
 0x1ef   :  { %v337_v37 = vmax.f32 %v329_v32, %v336_v30 }
 0x1f1   :  { %v293_v20 = vpop.f32.mrf.mxu2 }
 0x1f2   :  { %v294_v24 = vadd.f32 %v509_v43, %v293_v20 }
 0x1f4   :  { %v313_v31 = vmax.f32 %v294_v24, 0.0 }
 0x1f6   :  { %v338_v35 = vsel %vm315_vm4, %v313_v31, -inf }
 0x1f7   :  { %v339_v38 = vmax.f32 %v331_v33, %v338_v35 }
 0x1f9   :  { %v342_v40 = vmax.f32 %v337_v37, %v339_v38 }
 0x1fb   :  { %v344_v41 = vmax.f32 %v342_v40, %v343_v39 }
 0x1fd   :  { %v345_v42 = vmax.f32 %v344_v41, 0.0 }
 0x1ff   :  { %v346_v43 = vpack.c.bf16 %v345_v42, %v345_v42 }
 0x201   :  { %460 = vmatmul.msk.bf16.vlgmr.msrb.gmra.mxu2 %vm315_vm4, %v346_v43 }
 0x284   :  { %v372_v45 = vpop.f32.mrf.mxu2 }
 0x285   :  { %v373_v46 = vadd.f32 %v510_v44, %v372_v45 }
 0x287   :  { %v376_v47 = vmax.f32 %v373_v46, 0.0 }
 0x289   :  { %v377_v48 = vpack.c.bf16 %v376_v47, %v376_v47 }
 0x28b   :  { %469 = vmatmul.msk.bf16.vlgmr.msra.gmra.mxu3 %vm315_vm4, %v377_v48 }
 0x28c   :  { %v374_v49 = vpop.f32.mrf.mxu2 }
 0x30e   :  { %v403_v51 = vpop.f32.mrf.mxu3 }
 0x30f   :  { %v404_v52 = vadd.f32 %v511_v50, %v403_v51 }
 0x311   :  { %407 = vst [vmem:[%s642_s3] sm:$0xff] %v404_v52 }
 0x316   :  { %v405_v53 = vpop.f32.mrf.mxu3 }

</bundles_post_ra>
